<compile_context>
chip_gen: v6e
topology: v6e:2x2x1
jax: 0.10.0
libtpu: 0.0.40
codegen_flags: <defaults>
</compile_context>

<pallas_src>
import jax
import jax.numpy as jnp
from jax import lax
from jax.experimental import pallas as pl
from jax.experimental.pallas import tpu as pltpu


# ----------------------------------------------------------------------------
# generation-aware budgets / tiling helpers
# ----------------------------------------------------------------------------
def _vmem_budget_bytes():
    """Scoped-VMEM budget: generous on 128-MiB parts (v5e/v6e), capped on v7x (64 MiB)."""
    try:
        phys = int(getattr(pltpu.get_tpu_info(), "vmem_capacity_bytes"))
    except Exception:
        phys = 64 * 1024 * 1024  # conservative fallback (assume v7x-like)
    if phys >= 100 * 1024 * 1024:
        return 80 * 1024 * 1024
    return 40 * 1024 * 1024


def _choose_dst_tile(n, cap):
    """Largest multiple-of-32 divisor of n, <= min(cap, n//2); else the full extent.

    Multiples of 32 keep the int8 adjacency block on its native (32, 128) tiling and
    n//2 guarantees >= 2 tiles on the dst 'parallel' axis (v7x megacore)."""
    if n < 64:
        return n
    best = 0
    limit = min(cap, n // 2)
    cand = 32
    while cand <= limit:
        if n % cand == 0:
            best = cand
        cand += 32
    return best if best else n


def _choose_src_tile(n, cap):
    """Largest multiple-of-128 divisor of n, <= cap; full extent if n is small or not
    a multiple of 128 (lane-dim constraint: multiple of 128 or equal to full dim)."""
    if n <= cap or n % 128 != 0:
        return n
    best = 0
    cand = 128
    while cand <= cap:
        if n % cand == 0:
            best = cand
        cand += 128
    return best if best else n


def _choose_proj_tile(n):
    """Row tile for the projection kernel: must be a multiple of 128 (it is the lane dim
    of the transposed hlT output block) or the full extent."""
    if n % 128 != 0:
        return n
    for cand in (512, 256, 128):
        if n % cand == 0:
            return cand
    return n


# ----------------------------------------------------------------------------
# 1) GATv2 projections: hr = lin_r(x) [N, C]  and  hlT = lin_l(x)^T [C, N]
#    (hlT is produced directly in the transposed layout the stage-2 lane-dense
#     logit loop needs -- no in-kernel XLU transpose, no XLA slice copies.)
# ----------------------------------------------------------------------------
def gat_proj_kernel(x_ref, wr_ref, br_ref, xT_ref, wlT_ref, blT_ref, hr_ref, hlT_ref):
    hr_ref[...] = (
        jnp.dot(x_ref[...], wr_ref[...], preferred_element_type=jnp.float32)
        + br_ref[...]
    )
    hlT_ref[...] = (
        jnp.dot(wlT_ref[...], xT_ref[...], preferred_element_type=jnp.float32)
        + blT_ref[...]
    )


# ----------------------------------------------------------------------------
# 2) attention + aggregation, flash-style ONLINE masked softmax
#    grid = (dst tiles ["parallel"], src tiles ["arbitrary"])
# ----------------------------------------------------------------------------
def gat_attn_kernel(adj_ref, hlT_ref, hr_ref, att_ref, bias_ref, h_ref,
                    m_scr, l_scr, acc_scr):
    s_idx = pl.program_id(1)
    t_dst, t_src = adj_ref.shape
    n_src = hlT_ref.shape[1]
    c = hr_ref.shape[1]

    @pl.when(s_idx == 0)
    def _init():
        m_scr[...] = jnp.full(m_scr.shape, -jnp.inf, dtype=m_scr.dtype)
        l_scr[...] = jnp.zeros(l_scr.shape, dtype=l_scr.dtype)
        acc_scr[...] = jnp.zeros(acc_scr.shape, dtype=acc_scr.dtype)

    mask = adj_ref[...] > 0                         # int8 edge mask -> bool [t_dst, t_src]
    hr = hr_ref[...]                                # [t_dst, c]  lin_r(x_dst), f32

    # current src slice of the VMEM-resident transposed messages (lane-aligned slice)
    if t_src == n_src:
        hlT = hlT_ref[...]                          # [c, t_src]
    else:
        start = pl.multiple_of(s_idx * t_src, 128)
        hlT = hlT_ref[:, pl.ds(start, t_src)]

    # GATv2 logits: lane-dense per-channel accumulation on [t_dst, t_src] tiles.
    # att[c] is read as an SMEM scalar; no [t_dst, t_src, C] intermediate.
    e = jnp.zeros((t_dst, t_src), jnp.float32)
    for ci in range(c):                             # static unroll, C is small (32)
        s_c = hr[:, ci:ci + 1] + hlT[ci:ci + 1, :]  # [t_dst, t_src]
        s_c = jnp.where(s_c > 0, s_c, 0.2 * s_c)    # LeakyReLU, slope 0.2 (GATv2 default)
        e = e + att_ref[0, ci] * s_c
    e = jnp.where(mask, e, -1e30)

    # online (flash-style) softmax update over src tiles
    m_prev = m_scr[...]
    m_new = jnp.maximum(m_prev, jnp.max(e, axis=-1, keepdims=True))
    corr = jnp.exp(m_prev - m_new)
    p = jnp.where(mask, jnp.exp(e - m_new), 0.0)    # unnormalized alpha, f32
    l_scr[...] = corr * l_scr[...] + jnp.sum(p, axis=-1, keepdims=True)
    # aggregation: p [t_dst, t_src] contracted with hlT [c, t_src] on the src axis
    acc_scr[...] = corr * acc_scr[...] + lax.dot_general(
        p, hlT, (((1,), (1,)), ((), ())), preferred_element_type=jnp.float32)
    m_scr[...] = m_new

    @pl.when(s_idx == pl.num_programs(1) - 1)
    def _finalize():
        denom = jnp.maximum(l_scr[...], 1e-20)
        h_ref[...] = (acc_scr[...] / denom + bias_ref[...]).astype(h_ref.dtype)


# ----------------------------------------------------------------------------
# wrapper
# ----------------------------------------------------------------------------
def gat_model_forward(x, adj, pool, params):
    wl, bl, wr, br, att, bias, wfc, bfc = params
    n, f_in = x.shape
    c = wl.shape[1]
    g = pool.shape[0]

    budget = _vmem_budget_bytes()
    big_vmem = budget >= 64 * 1024 * 1024

    # ---- host-side prep: pad node count to a multiple of 64 ----
    # Padded nodes have no edges (fully masked -> h = bias) and zero pool weight, so the
    # result is unchanged; padding keeps dst tiles at multiples of 32 (int8 tiling) and
    # guarantees >= 2 tiles on the dst 'parallel' axis (v7x has 2 TensorCores).
    n_pad = max(64, ((n + 63) // 64) * 64)
    x_p = jnp.zeros((n_pad, f_in), jnp.float32).at[:n, :].set(x)
    adj_i8 = jnp.zeros((n_pad, n_pad), jnp.int8).at[:n, :n].set(
        (adj > 0).astype(jnp.int8))                              # int8 0/1 edge mask
    pool_p = jnp.zeros((g, n_pad), jnp.float32).at[:, :n].set(pool)

    # ---- 1) projections (row-tiled, parallel); hlT emitted pre-transposed ----
    t_n = _choose_proj_tile(n_pad)
    hr, hlT = pl.pallas_call(
        gat_proj_kernel,
        out_shape=(jax.ShapeDtypeStruct((n_pad, c), jnp.float32),
                   jax.ShapeDtypeStruct((c, n_pad), jnp.float32)),
        grid_spec=pltpu.PrefetchScalarGridSpec(
            num_scalar_prefetch=0,
            grid=(n_pad // t_n,),
            in_specs=[pl.BlockSpec((t_n, f_in), lambda i: (i, 0)),
                      pl.BlockSpec((f_in, c), lambda i: (0, 0)),
                      pl.BlockSpec((1, c), lambda i: (0, 0)),
                      pl.BlockSpec((f_in, t_n), lambda i: (0, i)),
                      pl.BlockSpec((c, f_in), lambda i: (0, 0)),
                      pl.BlockSpec((c, 1), lambda i: (0, 0))],
            out_specs=[pl.BlockSpec((t_n, c), lambda i: (i, 0)),
                       pl.BlockSpec((c, t_n), lambda i: (0, i))],
        ),
        compiler_params=pltpu.CompilerParams(
            dimension_semantics=("parallel",),
            vmem_limit_bytes=budget),
    )(x_p, wr, br, x_p.T, wl.T, bl.T)

    # ---- 2) attention + aggregation (dst-parallel x src-arbitrary) ----
    t_dst = _choose_dst_tile(n_pad, 256 if big_vmem else 128)
    t_src = _choose_src_tile(n_pad, 1024 if big_vmem else 256)
    grid = (n_pad // t_dst, n_pad // t_src)

    cost = pl.CostEstimate(
        flops=int(8 * n_pad * n_pad * c),                 # logits + softmax + aggregation
        transcendentals=int(n_pad * n_pad + n_pad * grid[1]),
        bytes_accessed=int(n_pad * n_pad                  # int8 adj (dominant stream)
                           + 3 * n_pad * c * 4),          # hlT (resident) + hr + h
    )

    h = pl.pallas_call(
        gat_attn_kernel,
        out_shape=jax.ShapeDtypeStruct((n_pad, c), jnp.float32),
        grid_spec=pltpu.PrefetchScalarGridSpec(
            num_scalar_prefetch=0,
            grid=grid,
            in_specs=[
                pl.BlockSpec((t_dst, t_src), lambda d, s: (d, s)),      # adj mask (int8)
                pl.BlockSpec((c, n_pad), lambda d, s: (0, 0)),          # hlT, VMEM-resident
                pl.BlockSpec((t_dst, c), lambda d, s: (d, 0)),          # hr (dst tile)
                pl.BlockSpec(memory_space=pltpu.MemorySpace.SMEM),      # att -> SMEM scalars
                pl.BlockSpec((1, c), lambda d, s: (0, 0)),              # conv bias
            ],
            out_specs=pl.BlockSpec((t_dst, c), lambda d, s: (d, 0)),
            scratch_shapes=[
                pltpu.VMEM((t_dst, 1), jnp.float32),   # running max
                pltpu.VMEM((t_dst, 1), jnp.float32),   # running denominator
                pltpu.VMEM((t_dst, c), jnp.float32),   # output accumulator
            ],
        ),
        compiler_params=pltpu.CompilerParams(
            dimension_semantics=("parallel", "arbitrary"),
            vmem_limit_bytes=budget),
        cost_estimate=cost,
    )(adj_i8, hlT, hr, att, bias)

    # ---- 3) tail: global_mean_pool + leaky_relu + dropout(eval) + fc ----
    # Done in plain XLA per the perf review: a third pallas_call for a (G, out) output was
    # pure launch overhead.  Padded nodes carry zero pool weight, so no slicing is needed.
    pooled = jnp.dot(pool_p, h)                             # [G, C] mean pool
    pooled = jnp.where(pooled > 0, pooled, 0.01 * pooled)   # F.leaky_relu default slope
    # TODO(synk): dropout is eval-mode identity (training parity would need pltpu.prng_*).
    return jnp.dot(pooled, wfc) + bfc                       # [G, out]


# ----------------------------------------------------------------------------
# pure-JAX reference (numerics check)
# ----------------------------------------------------------------------------
def _reference_forward(x, adj, pool, params):
    wl, bl, wr, br, att, bias, wfc, bfc = params
    hl = x @ wl + bl
    hr = x @ wr + br
    s = hr[:, None, :] + hl[None, :, :]
    s = jnp.where(s > 0, s, 0.2 * s)
    e = jnp.sum(s * att[None, :, :], axis=-1)
    e = jnp.where(adj > 0, e, -1e30)
    e = e - jnp.max(e, axis=-1, keepdims=True)
    p = jnp.where(adj > 0, jnp.exp(e), 0.0)
    alpha = p / jnp.maximum(jnp.sum(p, axis=-1, keepdims=True), 1e-20)
    h = alpha @ hl + bias
    pooled = pool @ h
    pooled = jnp.where(pooled > 0, pooled, 0.01 * pooled)
    return pooled @ wfc + bfc


if __name__ == "__main__":
    # sizes consistent with the module's forward
    N = 16            # total nodes (8 per graph)
    G = 2             # number of graphs (batch)
    IN_CH = 4
    HID_CH = 32
    OUT_CH = 8
    N_EDGES_PER_GRAPH = 12

    key = jax.random.PRNGKey(0)
    keys = jax.random.split(key, 12)

    # node features
    x = jax.random.normal(keys[0], (N, IN_CH), dtype=jnp.float32)

    # random within-graph edges, then add self loops (GATv2Conv default)
    src0 = jax.random.randint(keys[1], (N_EDGES_PER_GRAPH,), 0, N // 2)
    dst0 = jax.random.randint(keys[2], (N_EDGES_PER_GRAPH,), 0, N // 2)
    src1 = jax.random.randint(keys[3], (N_EDGES_PER_GRAPH,), N // 2, N)
    dst1 = jax.random.randint(keys[4], (N_EDGES_PER_GRAPH,), N // 2, N)
    src = jnp.concatenate([src0, src1])
    dst = jnp.concatenate([dst0, dst1])

    adj = jnp.zeros((N, N), dtype=jnp.float32)
    adj = adj.at[dst, src].set(1.0)                          # adj[dst, src] = 1
    adj = adj.at[jnp.arange(N), jnp.arange(N)].set(1.0)      # self loops

    # batch assignment: first 8 nodes -> graph 0, last 8 -> graph 1; mean-pool matrix
    batch = jnp.concatenate([jnp.zeros(N // 2, jnp.int32), jnp.ones(N // 2, jnp.int32)])
    pool = jax.nn.one_hot(jnp.arange(G), G, dtype=jnp.float32)[batch].T    # [G, N]
    pool = pool / jnp.sum(pool, axis=1, keepdims=True)

    # deterministic parameter init (glorot-ish scaled normals)
    def init(k, shape, fan_in):
        return jax.random.normal(k, shape, dtype=jnp.float32) / jnp.sqrt(float(fan_in))

    wl = init(keys[5], (IN_CH, HID_CH), IN_CH)       # GATv2Conv.lin_l weight
    bl = jnp.zeros((1, HID_CH), jnp.float32)         # GATv2Conv.lin_l bias
    wr = init(keys[6], (IN_CH, HID_CH), IN_CH)       # GATv2Conv.lin_r weight
    br = jnp.zeros((1, HID_CH), jnp.float32)         # GATv2Conv.lin_r bias
    att = init(keys[7], (1, HID_CH), HID_CH)         # GATv2Conv.att (heads=1)
    bias = jnp.zeros((1, HID_CH), jnp.float32)       # GATv2Conv.bias
    wfc = init(keys[8], (HID_CH, OUT_CH), HID_CH)    # fc weight
    bfc = init(keys[9], (1, OUT_CH), HID_CH)         # fc bias
    params = (wl, bl, wr, br, att, bias, wfc, bfc)

    out = gat_model_forward(x, adj, pool, params)
    out = jax.block_until_ready(out)
    assert out.shape == (G, OUT_CH)

    # numerics check vs pure-JAX reference (all kernel math is f32 now)
    ref = _reference_forward(x, adj, pool, params)
    max_err = float(jnp.max(jnp.abs(out - ref)))
    assert max_err < 1e-2, f"kernel/reference mismatch: {max_err}"

    print("KERNEL_OK")
</pallas_src>

<mosaic_0001>
module attributes {stable_mosaic.version = 11 : i64} {
  func.func @gat_proj_kernel(%arg0: i32, %arg1: memref<64x4xf32, #tpu.memory_space<vmem>>, %arg2: memref<4x32xf32, #tpu.memory_space<vmem>>, %arg3: memref<1x32xf32, #tpu.memory_space<vmem>>, %arg4: memref<4x64xf32, #tpu.memory_space<vmem>>, %arg5: memref<32x4xf32, #tpu.memory_space<vmem>>, %arg6: memref<32x1xf32, #tpu.memory_space<vmem>>, %arg7: memref<64x32xf32, #tpu.memory_space<vmem>>, %arg8: memref<32x64xf32, #tpu.memory_space<vmem>>) attributes {dimension_semantics = [#tpu.dimension_semantics<parallel>], iteration_bounds = array<i64: 1>, scalar_prefetch = 0 : i64, scratch_operands = 0 : i64, tpu.core_type = #tpu.core_type<tc>, window_params = [{transform_indices = @transform_0, window_bounds = array<i64: 64, 4>}, {pipeline_mode = #tpu.pipeline_mode<synchronous>, transform_indices = @transform_1, window_bounds = array<i64: 4, 32>}, {pipeline_mode = #tpu.pipeline_mode<synchronous>, transform_indices = @transform_2, window_bounds = array<i64: 1, 32>}, {transform_indices = @transform_3, window_bounds = array<i64: 4, 64>}, {pipeline_mode = #tpu.pipeline_mode<synchronous>, transform_indices = @transform_4, window_bounds = array<i64: 32, 4>}, {pipeline_mode = #tpu.pipeline_mode<synchronous>, transform_indices = @transform_5, window_bounds = array<i64: 32, 1>}, {transform_indices = @transform_6, window_bounds = array<i64: 64, 32>}, {transform_indices = @transform_7, window_bounds = array<i64: 32, 64>}]} {
    %c0 = arith.constant 0 : index
    %c0_0 = arith.constant 0 : index
    %0 = vector.load %arg1[%c0, %c0_0] : memref<64x4xf32, #tpu.memory_space<vmem>>, vector<64x4xf32>
    %c0_1 = arith.constant 0 : index
    %c0_2 = arith.constant 0 : index
    %1 = vector.load %arg2[%c0_1, %c0_2] : memref<4x32xf32, #tpu.memory_space<vmem>>, vector<4x32xf32>
    %cst = arith.constant dense<0.000000e+00> : vector<64x32xf32>
    %2 = tpu.matmul %0, %1, %cst {dimension_numbers = #tpu.dot_dimension_numbers<[1], [0], [0], [1], [0, 0, 1, 1], [], []>} : vector<64x4xf32>, vector<4x32xf32>, vector<64x32xf32> -> vector<64x32xf32>
    %c0_3 = arith.constant 0 : index
    %c0_4 = arith.constant 0 : index
    %3 = vector.load %arg3[%c0_3, %c0_4] : memref<1x32xf32, #tpu.memory_space<vmem>>, vector<1x32xf32>
    %4 = vector.broadcast %3 : vector<1x32xf32> to vector<64x32xf32>
    %5 = arith.addf %2, %4 : vector<64x32xf32>
    %c0_5 = arith.constant 0 : index
    %c0_6 = arith.constant 0 : index
    %6 = vector.load %arg7[%c0_5, %c0_6] : memref<64x32xf32, #tpu.memory_space<vmem>>, vector<64x32xf32>
    tpu.vector_store %arg7[%c0_5, %c0_6], %5 {strides = array<i32>} : memref<64x32xf32, #tpu.memory_space<vmem>>, vector<64x32xf32>,
    %c0_7 = arith.constant 0 : index
    %c0_8 = arith.constant 0 : index
    %7 = vector.load %arg5[%c0_7, %c0_8] : memref<32x4xf32, #tpu.memory_space<vmem>>, vector<32x4xf32>
    %c0_9 = arith.constant 0 : index
    %c0_10 = arith.constant 0 : index
    %8 = vector.load %arg4[%c0_9, %c0_10] : memref<4x64xf32, #tpu.memory_space<vmem>>, vector<4x64xf32>
    %cst_11 = arith.constant dense<0.000000e+00> : vector<32x64xf32>
    %9 = tpu.matmul %7, %8, %cst_11 {dimension_numbers = #tpu.dot_dimension_numbers<[1], [0], [0], [1], [0, 0, 1, 1], [], []>} : vector<32x4xf32>, vector<4x64xf32>, vector<32x64xf32> -> vector<32x64xf32>
    %c0_12 = arith.constant 0 : index
    %c0_13 = arith.constant 0 : index
    %10 = vector.load %arg6[%c0_12, %c0_13] : memref<32x1xf32, #tpu.memory_space<vmem>>, vector<32x1xf32>
    %11 = vector.broadcast %10 : vector<32x1xf32> to vector<32x64xf32>
    %12 = arith.addf %9, %11 : vector<32x64xf32>
    %c0_14 = arith.constant 0 : index
    %c0_15 = arith.constant 0 : index
    %13 = vector.load %arg8[%c0_14, %c0_15] : memref<32x64xf32, #tpu.memory_space<vmem>>, vector<32x64xf32>
    tpu.vector_store %arg8[%c0_14, %c0_15], %12 {strides = array<i32>} : memref<32x64xf32, #tpu.memory_space<vmem>>, vector<32x64xf32>,
    return
  }
  func.func @transform_0(%arg0: i32) -> (i32, i32) {
    %c0_i32 = arith.constant 0 : i32
    %c0_i32_0 = arith.constant 0 : i32
    return %arg0, %c0_i32 : i32, i32
  }
  func.func @transform_1(%arg0: i32) -> (i32, i32) {
    %c0_i32 = arith.constant 0 : i32
    %c0_i32_0 = arith.constant 0 : i32
    %c0_i32_1 = arith.constant 0 : i32
    return %c0_i32, %c0_i32_0 : i32, i32
  }
  func.func @transform_2(%arg0: i32) -> (i32, i32) {
    %c0_i32 = arith.constant 0 : i32
    %c0_i32_0 = arith.constant 0 : i32
    %c0_i32_1 = arith.constant 0 : i32
    return %c0_i32, %c0_i32_0 : i32, i32
  }
  func.func @transform_3(%arg0: i32) -> (i32, i32) {
    %c0_i32 = arith.constant 0 : i32
    %c0_i32_0 = arith.constant 0 : i32
    return %c0_i32, %arg0 : i32, i32
  }
  func.func @transform_4(%arg0: i32) -> (i32, i32) {
    %c0_i32 = arith.constant 0 : i32
    %c0_i32_0 = arith.constant 0 : i32
    %c0_i32_1 = arith.constant 0 : i32
    return %c0_i32, %c0_i32_0 : i32, i32
  }
  func.func @transform_5(%arg0: i32) -> (i32, i32) {
    %c0_i32 = arith.constant 0 : i32
    %c0_i32_0 = arith.constant 0 : i32
    %c0_i32_1 = arith.constant 0 : i32
    return %c0_i32, %c0_i32_0 : i32, i32
  }
  func.func @transform_6(%arg0: i32) -> (i32, i32) {
    %c0_i32 = arith.constant 0 : i32
    %c0_i32_0 = arith.constant 0 : i32
    return %arg0, %c0_i32 : i32, i32
  }
  func.func @transform_7(%arg0: i32) -> (i32, i32) {
    %c0_i32 = arith.constant 0 : i32
    %c0_i32_0 = arith.constant 0 : i32
    return %c0_i32, %arg0 : i32, i32
  }
}

</mosaic_0001>

<bundles_post_ra>
// kernel: tpu_custom_call.1
= control target key start
LH: loop header
LB: loop body
LE: loop exit
PB: predicated region body
PF: predicated region fallthrough
CT: control target
= control target key end

     0   :  { %vm67_vm0 = vcmask 1043456   ;;  %vm42_vm1 = vcmask 31744   ;;  %s578_s0 = inlined_call_operand.vmem [shape: f32[64,4], index: 0, kind: input, shape index: {}]   ;;  %s579_s1 = inlined_call_operand.vmem [shape: f32[4,32], index: 1, kind: input, shape index: {}]   ;;  %s580_s2 = inlined_call_operand.vmem [shape: f32[1,32], index: 2, kind: input, shape index: {}]   ;;  %s581_s3 = inlined_call_operand.vmem [shape: f32[4,64], index: 3, kind: input, shape index: {}]   ;;  %s582_s4 = inlined_call_operand.vmem [shape: f32[32,4], index: 4, kind: input, shape index: {}]   ;;  %s583_s5 = inlined_call_operand.vmem [shape: f32[32,1], index: 5, kind: input, shape index: {}]   ;;  %s584_s6 = inlined_call_operand.vmem [shape: f32[64,32], index: 6, kind: output, shape index: {0}]   ;;  %s585_s7 = inlined_call_operand.hbm [shape: f32[32,64], index: 7, kind: output, shape index: {1}]  }
   0x1   :  { %v34_v0 = vld [vmem:[%s579_s1] sm:$0xf]  ;;  %v32_v2 = vld [vmem:[%s578_s0 + $0x30] sm:$0xff]  ;;  %v27_v3 = vld [vmem:[%s578_s0 + $0x8] sm:$0xff] }
   0x2   :  { %v26_v1 = vld [vmem:[%s578_s0] sm:$0xff]  ;;  %368 = vmatprep.subr.msk.mxu0 %vm67_vm0, %v34_v0  ;;  %390 = vmatprep.subr.msk.mxu1 %vm67_vm0, %v34_v0  ;;  %v33_v4 = vld [vmem:[%s578_s0 + $0x38] sm:$0xff]  ;;  %v28_v6 = vld [vmem:[%s578_s0 + $0x10] sm:$0xff] }
   0x3   :  { %369 = vmatpush3.msk.msra.mxu0 %vm67_vm0, %v34_v0  ;;  %391 = vmatpush3.msk.msra.mxu1 %vm67_vm0, %v34_v0  ;;  %v189_v5 = vld [vmem:[%s581_s3] sm:$0xf]  ;;  %v29_v8 = vld [vmem:[%s578_s0 + $0x18] sm:$0xff]  ;;  %v186_v9 = vld [vmem:[%s582_s4 + $0x8] sm:$0xff] }
   0x4   :  { %370 = vmatprep.mubr.msk.f32.mxu0 %vm42_vm1, %v26_v1  ;;  %379 = vmatprep.mubr.msk.f32.mxu1 %vm42_vm1, %v32_v2  ;;  %v185_v7 = vld [vmem:[%s582_s4] sm:$0xff]  ;;  %v187_v11 = vld [vmem:[%s582_s4 + $0x10] sm:$0xff] }
   0x5   :  { %371 = vmatmul.mubr.msk.f32.vlgmr.msra.gmra.mxu0 %vm42_vm1, %v27_v3  ;;  %380 = vmatmul.mubr.msk.f32.vlgmr.msra.gmra.mxu1 %vm42_vm1, %v33_v4  ;;  %v30_v10 = vld [vmem:[%s578_s0 + $0x20] sm:$0xff] }
   0x6   :  { %382 = vmatprep.subr.msk.mxu1 %vm67_vm0, %v189_v5  ;;  %373 = vmatprep.mubr.msk.f32.mxu0 %vm42_vm1, %v28_v6 }
   0x7   :  { %383 = vmatpush3.msk.msra.mxu1 %vm67_vm0, %v189_v5  ;;  %384 = vmatprep.mubr.msk.f32.mxu1 %vm42_vm1, %v185_v7 }
   0x8   :  { %13 = vsyncpa [#allocation3], 0  ;;  %v420_v12 = vmov 0   ;;  %v190_v13 = vld [vmem:[%s583_s5] sm:$0xff]  ;;  %v192_v14 = vld [vmem:[%s583_s5 + $0x10] sm:$0xff]  ;;  %vm176_vm2 = vcmask 261120  }
   0x9   :  { %396 = vset.pattern.permute.xlu0 %v420_v12  ;;  %397 = vset.pattern.permute.xlu1 %v420_v12  ;;  %v31_v15 = vld [vmem:[%s578_s0 + $0x28] sm:$0xff]  ;;  %v188_v16 = vld [vmem:[%s582_s4 + $0x18] sm:$0xff]  ;;  %v339_v20 = vld [vmem:[%s580_s2] ss:$0 sm:$0xff]  ;;  %vm314_vm3 = vcmask 523264   ;;  %s421_s18 = smov [#allocation2]  }
   0xa   :  { %374 = vmatmul.mubr.msk.f32.gmra.mxu0 %vm42_vm1, %v29_v8  ;;  %385 = vmatmul.mubr.msk.f32.vlgmr.msra.gmra.mxu1 %vm42_vm1, %v186_v9  ;;  %v191_v17 = vld [vmem:[%s583_s5 + $0x8] sm:$0xff]  ;;  %v193_v18 = vld [vmem:[%s583_s5 + $0x18] sm:$0xff]  ;;  %s326_s19 = sshll.u32 %s421_s18, 4  ;;  %s327_s19 = int_to_ptr.vmem [resolvable:$true] %s326_s19 }
   0xb   :  { %376 = vmatprep.mubr.msk.f32.mxu0 %vm42_vm1, %v30_v10  ;;  %387 = vmatprep.mubr.msk.f32.mxu1 %vm42_vm1, %v187_v11  ;;  %s398_s26 = scalar_lea.vmem %s327_s19, 512  ;;  %p403_p1 = scmp.lt.s32.totalorder %s327_s19, %s327_s19 }
   0xc   :  { %196 = vperm.xlu0 %396, %v190_v13   ;;  %206 = vperm.xlu1 %397, %v192_v14   ;;  %p399_p0 = scmp.ne.s32.totalorder %s327_s19, %s398_s26  ;;  %p404_p2 = scmp.lt.s32.totalorder %s398_s26, %s398_s26 }
   0xe   :  { %377 = vmatmul.mubr.msk.f32.gmra.mxu0 %vm42_vm1, %v31_v15  ;;  %388 = vmatmul.mubr.msk.f32.gmra.mxu1 %vm42_vm1, %v188_v16  ;;  %p405_p3 = por %p404_p2, %p403_p1 }
  0x10   :  { %201 = vperm.xlu0 %396, %v191_v17   ;;  %211 = vperm.xlu1 %397, %v193_v18   ;;  %p406_p4 = pnand %p405_p3, %p399_p0 }
  0x87   :  { %v197_v19 = vpop.permute.xlu0 %196  ;;  %v207_v25 = vpop.permute.xlu1 %206 }
  0x8b   :  { %v202_v26 = vpop.permute.xlu0 %201  ;;  %v212_v39 = vpop.permute.xlu1 %211 }
  0xc5   :  { %v372_v21 = vpop.f32.mrf.mxu0  ;;  %v381_v22 = vpop.f32.mrf.mxu1 }
  0xc6   :  { %v143_v23 = vadd.f32 %v372_v21, %v339_v20  ;;  %v173_v24 = vadd.f32 %v381_v22, %v339_v20 }
  0xc7   :  { %v137_v27 = vpop.f32.mrf.mxu0  ;;  %v167_v28 = vpop.f32.mrf.mxu1 }
  0xc8   :  { %178 = vst.msk [vmem:[%s584_s6 + $0x8] sm:$0xff] %vm176_vm2, %v143_v23  ;;  %184 = vst.msk [vmem:[%s584_s6 + $0x38] sm:$0xff] %vm176_vm2, %v173_v24  ;;  %v138_v29 = vadd.f32 %v339_v20, %v137_v27  ;;  %v168_v30 = vadd.f32 %v339_v20, %v167_v28 }
  0xca   :  { %v375_v31 = vpop.f32.mrf.mxu0  ;;  %v386_v32 = vpop.f32.mrf.mxu1  ;;  %177 = vst.msk [vmem:[%s584_s6] sm:$0xff] %vm176_vm2, %v138_v29  ;;  %183 = vst.msk [vmem:[%s584_s6 + $0x30] sm:$0xff] %vm176_vm2, %v168_v30 }
  0xcb   :  { %v153_v33 = vadd.f32 %v375_v31, %v339_v20  ;;  %v301_v34 = vadd.f32 %v386_v32, %v202_v26 }
  0xcc   :  { %v147_v35 = vpop.f32.mrf.mxu0  ;;  %v295_v36 = vpop.f32.mrf.mxu1 }
  0xcd   :  { %180 = vst.msk [vmem:[%s584_s6 + $0x18] sm:$0xff] %vm176_vm2, %v153_v33  ;;  %v148_v37 = vadd.f32 %v339_v20, %v147_v35  ;;  %v296_v38 = vadd.f32 %v295_v36, %v197_v19 }
  0xce   :  { %316 = vst.msk [vmem:[#allocation2 + $0x8] sm:$0xff] %vm314_vm3, %v301_v34  ;;  %v378_v40 = vpop.f32.mrf.mxu0  ;;  %v389_v41 = vpop.f32.mrf.mxu1 }
  0xcf   :  { %179 = vst.msk [vmem:[%s584_s6 + $0x10] sm:$0xff] %vm176_vm2, %v148_v37  ;;  %v163_v42 = vadd.f32 %v378_v40, %v339_v20  ;;  %v311_v43 = vadd.f32 %v389_v41, %v212_v39 }
  0xd0   :  { %315 = vst.msk [vmem:[#allocation2] sm:$0xff] %vm314_vm3, %v296_v38  ;;  %v157_v44 = vpop.f32.mrf.mxu0  ;;  %v305_v45 = vpop.f32.mrf.mxu1 }
  0xd1   :  { %182 = vst.msk [vmem:[%s584_s6 + $0x28] sm:$0xff] %vm176_vm2, %v163_v42  ;;  %v158_v46 = vadd.f32 %v339_v20, %v157_v44  ;;  %v306_v47 = vadd.f32 %v305_v45, %v207_v25 }
  0xd2   :  { %318 = vst.msk [vmem:[#allocation2 + $0x18] sm:$0xff] %vm314_vm3, %v311_v43 }
  0xd3   :  { %181 = vst.msk [vmem:[%s584_s6 + $0x20] sm:$0xff] %vm176_vm2, %v158_v46 }
  0xd4   :  { %317 = vst.msk [vmem:[#allocation2 + $0x10] sm:$0xff] %vm314_vm3, %v306_v47 }
  0xd5   :  { %409 = shalt.err (!%p406_p4)
}
  0xd6   :  { %s422_s27 = smov 128   ;;  %s423_s28 = smov 8  }
  0xd7   :  { %332 = dma.vmem_to_hbm [thread:$0]  %s327_s19, 512, %s585_s7, [#allocation3], %s422_s27, %s422_s27, %s423_s28  }
  0xd8   :  { %418 = dma.done.wait [#allocation3], 512  }
  0xd9   :  { %419 = vsyncadd [#allocation3], 4294966784 }
  0xda   :  { %338 = vsyncpa [#allocation3], 1 }

</bundles_post_ra>
